<compile_context>
chip_gen: v5e
topology: v5e:2x2
jax: 0.10.0
libtpu: 0.0.40
codegen_flags: <defaults>
</compile_context>

<pallas_src>
import jax
import jax.numpy as jnp
from jax.experimental import pallas as pl
from jax.experimental.pallas import tpu as pltpu


def _round_up(n: int, m: int) -> int:
    return ((n + m - 1) // m) * m


# ---------------------------------------------------------------------------
# Kernels
# ---------------------------------------------------------------------------
def _obs_copy_kernel(x_ref, o_ref):
    """Plain column-slice copy.  x_ref: (tb, in_cols); o_ref: (tb, dim_y)."""
    o_ref[...] = x_ref[:, : o_ref.shape[1]]


def _obs_transpose_kernel(x_ref, o_ref):
    """Lane-dense variant for dim_y < 128 (requires dim_x >= 128).

    x_ref: (tb, 128)    first 128 feature columns of tb batch rows
    o_ref: (dim_y, tb)  transposed output tile; tb is a 128-multiple so the
                        stores are full-width and the VMEM->HBM writeback is a
                        dense contiguous DMA (no per-row strided writes).
    The (tb,128)->(128,tb) transpose is fully (8,128)-aligned XLU work that
    hides under the input DMA; rows >= dim_y of the transposed tile are never
    stored.
    """
    xt = x_ref[...].T
    o_ref[...] = xt[: o_ref.shape[0], :]


# ---------------------------------------------------------------------------
# Per-generation VMEM budgets
#   v5e: 16 MiB scoped default / 128 MiB physical
#   v6e: 32 MiB scoped default / 128 MiB physical
#   v7x: 32 MiB scoped default /  64 MiB physical (2 TensorCores)
# ---------------------------------------------------------------------------
_VMEM_LIMIT_BYTES = 32 << 20  # legal everywhere: >= default, <= physical


def _vmem_tile_budget_bytes() -> int:
    try:
        kind = jax.devices()[0].device_kind.lower()
    except Exception:  # pragma: no cover - defensive only
        kind = ""
    if ("v6" in kind) or ("v7" in kind):
        # MiB-scale tiles; deliberately NOT extrapolated to 128 MiB because
        # v7x only has 64 MiB of physical VMEM.
        return 24 << 20
    return 12 << 20  # v5e / unknown: conservative (16 MiB scoped default)


def _choose_batch_tile(batch: int, vmem_bytes_per_row: int, row_align: int,
                       budget: int) -> int:
    """Largest row-aligned batch tile whose double-buffered, lane-padded VMEM
    footprint fits `budget` (byte-based sizing, no fixed row cap), capped at
    the aligned batch and then split so the grid keeps >= 2 blocks: on v7x
    dimension_semantics=("parallel",) can then shard the copy across both
    TensorCores; on v5e/v6e the extra grid step costs ~0.35 us."""
    tb = (budget // max(vmem_bytes_per_row, 1)) // row_align * row_align
    tb = max(row_align, tb)
    tb = min(tb, _round_up(batch, row_align))
    if batch > row_align:
        tb = min(tb, _round_up(pl.cdiv(batch, 2), row_align))
    return tb


# ---------------------------------------------------------------------------
# Pallas variants
# ---------------------------------------------------------------------------
def _pallas_plain(x, dim_y, budget):
    batch, dim_x = x.shape
    itemsize = x.dtype.itemsize
    # Round the read width up to a lane multiple instead of reading full rows:
    # cuts HBM read traffic by dim_x / round_up(dim_y, 128) whenever dim_y << dim_x.
    in_cols = min(dim_x, _round_up(dim_y, 128))
    # dtype-aware sublane alignment: 8 rows f32, 16 bf16, 32 int8/fp8.
    row_align = max(8, 32 // itemsize)
    # VMEM accounting uses lane-padded widths (a (tb, 3) block still occupies
    # 128 lanes of VMEM), x2 for double buffering of input and output.
    row_bytes = 2 * (_round_up(in_cols, 128) + _round_up(dim_y, 128)) * itemsize
    tb = _choose_batch_tile(batch, row_bytes, row_align, budget)
    return pl.pallas_call(
        _obs_copy_kernel,
        out_shape=jax.ShapeDtypeStruct((batch, dim_y), x.dtype),
        grid=(pl.cdiv(batch, tb),),
        in_specs=[pl.BlockSpec((tb, in_cols), lambda i: (i, 0))],
        out_specs=pl.BlockSpec((tb, dim_y), lambda i: (i, 0)),
        compiler_params=pltpu.CompilerParams(
            dimension_semantics=("parallel",),
            vmem_limit_bytes=_VMEM_LIMIT_BYTES),
        cost_estimate=pl.CostEstimate(
            flops=0, transcendentals=0,
            bytes_accessed=batch * (in_cols + dim_y) * itemsize),
    )(x)


def _pallas_transposed(x, dim_y, budget):
    batch, dim_x = x.shape
    itemsize = x.dtype.itemsize
    assert dim_y < 128 <= dim_x
    in_cols = 128        # 128-aligned read window (>= dim_y)
    row_align = 128      # output minor dim (tb) must be a 128-multiple
    # 2x input buffers + headroom for the (128, tb) transpose intermediate the
    # compiler spills to VMEM + 2x transposed output buffers.
    row_bytes = (2 * 128 + 128 + 2 * _round_up(dim_y, 8)) * itemsize
    tb = _choose_batch_tile(batch, row_bytes, row_align, budget)
    out_t = pl.pallas_call(
        _obs_transpose_kernel,
        out_shape=jax.ShapeDtypeStruct((dim_y, batch), x.dtype),
        grid=(pl.cdiv(batch, tb),),
        in_specs=[pl.BlockSpec((tb, in_cols), lambda i: (i, 0))],
        out_specs=pl.BlockSpec((dim_y, tb), lambda i: (0, i)),
        compiler_params=pltpu.CompilerParams(
            dimension_semantics=("parallel",),
            vmem_limit_bytes=_VMEM_LIMIT_BYTES),
        cost_estimate=pl.CostEstimate(
            flops=0, transcendentals=0,
            bytes_accessed=batch * (in_cols + dim_y) * itemsize),
    )(x)
    # Undo the layout in the wrapper: free relabel for dim_y == 1, otherwise a
    # tiny XLA transpose of batch*dim_y elements (small vs. the kernel's reads).
    return out_t.reshape(batch, 1) if dim_y == 1 else out_t.T


# ---------------------------------------------------------------------------
# Public wrapper
# ---------------------------------------------------------------------------
def observation_model_forward(x: jax.Array, dim_y: int, *,
                              force_pallas: bool = False,
                              min_pallas_elems: int = 1 << 20) -> jax.Array:
    """Pallas/TPU equivalent of observation_model(dim_y).forward(x) = x[:, :dim_y]."""
    batch, dim_x = x.shape
    if not (0 < dim_y <= dim_x):
        raise ValueError(f"dim_y={dim_y} must satisfy 0 < dim_y <= dim_x={dim_x}")

    # ---- XLA fast path ------------------------------------------------------
    # x[:, :dim_y] in XLA is already a roofline-bound strided copy that fuses
    # with neighbouring ops (zero extra HBM round trip).  The shapes this
    # module actually sees (batch <= bs = 40, dim_x = 3, dim_y = 1) always take
    # this path; a standalone Pallas copy can at best match it.
    if not force_pallas and x.size < min_pallas_elems:
        return x[:, :dim_y]

    budget = _vmem_tile_budget_bytes()
    itemsize = x.dtype.itemsize

    # Degenerate guard: rows so wide that a single minimally-aligned tile would
    # not fit the scoped-VMEM limit go back to XLA.
    if 4 * _round_up(min(dim_x, _round_up(dim_y, 128)), 128) * itemsize * 8 > _VMEM_LIMIT_BYTES:
        return x[:, :dim_y]

    # ---- lane-dense transposed output path (dim_y < 128) --------------------
    # A (batch, dim_y<128) output slab forces dim_y-lane masked stores and a
    # per-row strided VMEM->HBM writeback; a transposed (dim_y, batch) slab
    # makes both lane-dense.  Requires dim_x >= 128 so the transpose operand is
    # a fully aligned (tb, 128) tile, and a >=16-bit dtype (packed transposes).
    if dim_y < 128 and dim_x >= 128 and itemsize >= 2:
        try:
            return _pallas_transposed(x, dim_y, budget)
        except Exception:
            # Defensive: if this jaxlib/Mosaic rejects the in-kernel transpose,
            # fall back to the plain masked-store copy.  Semantics identical.
            pass

    # ---- plain column-slice copy ---------------------------------------------
    # Covers dim_y >= 128 (already lane-dense) and narrow inputs (dim_x < 128),
    # where any per-row treatment is dominated by 128-lane VMEM padding anyway.
    # TODO(synk): lane-repacking variant for large-batch dim_x<128 workloads.
    return _pallas_plain(x, dim_y, budget)


if __name__ == "__main__":
    key = jax.random.PRNGKey(0)
    k0, k1, k2, k3, k4 = jax.random.split(key, 5)

    # 1) The shapes the module actually uses: x = nodes[index, 0].unsqueeze(0)
    #    -> (1, dim_x); batch=2 to exercise the batch dim.  dim_x=3, dim_y=1.
    x_small = jax.random.normal(k0, (2, 3), dtype=jnp.float32)
    y_small = jax.block_until_ready(observation_model_forward(x_small, 1))
    assert y_small.shape == (2, 1)
    assert jnp.array_equal(y_small, x_small[:, :1])

    # 2) Forced Pallas, narrow rows (plain path, in_cols == dim_x == 3).
    x_narrow = jax.random.normal(k1, (4096, 3), dtype=jnp.float32)
    y_narrow = jax.block_until_ready(
        observation_model_forward(x_narrow, 1, force_pallas=True))
    assert jnp.array_equal(y_narrow, x_narrow[:, :1])

    # 3) Forced Pallas, wide rows with dim_y a 128-multiple (plain path; the
    #    input DMA streams only the first 128 of 256 columns).
    x_wide = jax.random.normal(k2, (512, 256), dtype=jnp.float32)
    y_wide = jax.block_until_ready(
        observation_model_forward(x_wide, 128, force_pallas=True))
    assert jnp.array_equal(y_wide, x_wide[:, :128])

    # 4) Forced Pallas, lane-dense transposed path (dim_y=5 < 128 <= dim_x),
    #    ragged batch (600 % 128 != 0) to exercise masked writeback.
    x_t = jax.random.normal(k3, (600, 256), dtype=jnp.float32)
    y_t = jax.block_until_ready(
        observation_model_forward(x_t, 5, force_pallas=True))
    assert y_t.shape == (600, 5)
    assert jnp.array_equal(y_t, x_t[:, :5])

    # 5) Forced Pallas, bf16 (dtype-aware alignment + packed transpose path).
    x_bf = jax.random.normal(k4, (1024, 384), dtype=jnp.bfloat16)
    y_bf = jax.block_until_ready(
        observation_model_forward(x_bf, 64, force_pallas=True))
    assert jnp.array_equal(y_bf, x_bf[:, :64])

    print("KERNEL_OK")
</pallas_src>

<mosaic_0001>
module attributes {stable_mosaic.version = 11 : i64} {
  func.func @_obs_copy_kernel(%arg0: i32, %arg1: memref<2048x3xf32, #tpu.memory_space<vmem>>, %arg2: memref<2048x1xf32, #tpu.memory_space<vmem>>) attributes {dimension_semantics = [#tpu.dimension_semantics<parallel>], iteration_bounds = array<i64: 2>, scalar_prefetch = 0 : i64, scratch_operands = 0 : i64, tpu.core_type = #tpu.core_type<tc>, window_params = [{transform_indices = @transform_0, window_bounds = array<i64: 2048, 3>}, {transform_indices = @transform_1, window_bounds = array<i64: 2048, 1>}]} {
    %c0 = arith.constant 0 : index
    %c0_0 = arith.constant 0 : index
    %0 = vector.load %arg1[%c0, %c0_0] : memref<2048x3xf32, #tpu.memory_space<vmem>>, vector<2048x1xf32>
    %c0_1 = arith.constant 0 : index
    %c0_2 = arith.constant 0 : index
    %1 = vector.load %arg2[%c0_1, %c0_2] : memref<2048x1xf32, #tpu.memory_space<vmem>>, vector<2048x1xf32>
    tpu.vector_store %arg2[%c0_1, %c0_2], %0 {strides = array<i32>} : memref<2048x1xf32, #tpu.memory_space<vmem>>, vector<2048x1xf32>,
    return
  }
  func.func @transform_0(%arg0: i32) -> (i32, i32) {
    %c0_i32 = arith.constant 0 : i32
    %c0_i32_0 = arith.constant 0 : i32
    return %arg0, %c0_i32 : i32, i32
  }
  func.func @transform_1(%arg0: i32) -> (i32, i32) {
    %c0_i32 = arith.constant 0 : i32
    %c0_i32_0 = arith.constant 0 : i32
    return %arg0, %c0_i32 : i32, i32
  }
}

</mosaic_0001>

<bundles_post_ra>
// kernel: tpu_custom_call.1
= control target key start
LH: loop header
LB: loop body
LE: loop exit
PB: predicated region body
PF: predicated region fallthrough
CT: control target
= control target key end

     0   :  { %s726_s6 = smov 0   ;;  %s1515_s0 = inlined_call_operand.vmem [shape: f32[4096,3], index: 0, kind: input, shape index: {}]   ;;  %s1516_s1 = inlined_call_operand.vmem [shape: f32[4096,1], index: 1, kind: output, shape index: {}]  }
   0x1 LB: > { %s689_s7 = sadd.s32 4294967295, %s714_s6   ;;  %p693_p0 = scmp.ge.s32.totalorder %s714_s6, 1  ;;  %s714_s6 = sphi %s726_s6, %s11_s6  }
   0x2   : > { %p88_p1 = scmp.lt.s32.totalorder %s714_s6, 3 }
   0x4   : > { %p89_p2 = pnand %p693_p0, %p88_p1 }
   0x5   : > { %s694_s8 = sshll.u32 (!%p89_p2), %s689_s7, 8 }
   0x6   : > { %92 = sbr.rel (%p89_p2) target bundleno = 271 (0x10f), region = 24  ;;  %p109_p3 = scmp.lt.s32.totalorder (!%p89_p2), %s694_s8, 511 }
   0xb   : > { %s1518_s8 = smov (!%p109_p3, %s694_s8), 511  ;;  %vm376_vm0 = vcmask 7168  }
   0xc   : > { %s695_s9 = sshll.u32 %s1518_s8, 3 }
   0xd   : > { %s737_s12 = scalar_lea.vmem %s1515_s0, %s695_s9  ;;  %s742_s15 = scalar_lea.vmem %s1516_s1, %s695_s9 }
   0xe   : > { %v120_v0 = vld [vmem:[%s737_s12] sm:$0xff]  ;;  %v121_v1 = vld [vmem:[%s737_s12 + $0x8] sm:$0xff]  ;;  %v122_v2 = vld [vmem:[%s737_s12 + $0x10] sm:$0xff] }
   0xf   : > { %377 = vst.msk [vmem:[%s742_s15] sm:$0xff] %vm376_vm0, %v120_v0  ;;  %v123_v3 = vld [vmem:[%s737_s12 + $0x18] sm:$0xff]  ;;  %v124_v4 = vld [vmem:[%s737_s12 + $0x20] sm:$0xff]  ;;  %v125_v5 = vld [vmem:[%s737_s12 + $0x28] sm:$0xff] }
  0x10   : > { %378 = vst.msk [vmem:[%s742_s15 + $0x8] sm:$0xff] %vm376_vm0, %v121_v1  ;;  %v126_v6 = vld [vmem:[%s737_s12 + $0x30] sm:$0xff]  ;;  %v127_v7 = vld [vmem:[%s737_s12 + $0x38] sm:$0xff]  ;;  %v128_v8 = vld [vmem:[%s737_s12 + $0x40] sm:$0xff] }
  0x11   : > { %379 = vst.msk [vmem:[%s742_s15 + $0x10] sm:$0xff] %vm376_vm0, %v122_v2  ;;  %v129_v9 = vld [vmem:[%s737_s12 + $0x48] sm:$0xff]  ;;  %v130_v10 = vld [vmem:[%s737_s12 + $0x50] sm:$0xff]  ;;  %v131_v11 = vld [vmem:[%s737_s12 + $0x58] sm:$0xff] }
  0x12   : > { %380 = vst.msk [vmem:[%s742_s15 + $0x18] sm:$0xff] %vm376_vm0, %v123_v3  ;;  %v132_v12 = vld [vmem:[%s737_s12 + $0x60] sm:$0xff]  ;;  %v133_v13 = vld [vmem:[%s737_s12 + $0x68] sm:$0xff]  ;;  %v134_v14 = vld [vmem:[%s737_s12 + $0x70] sm:$0xff] }
  0x13   : > { %381 = vst.msk [vmem:[%s742_s15 + $0x20] sm:$0xff] %vm376_vm0, %v124_v4  ;;  %v135_v15 = vld [vmem:[%s737_s12 + $0x78] sm:$0xff]  ;;  %v136_v16 = vld [vmem:[%s737_s12 + $0x80] sm:$0xff]  ;;  %v137_v17 = vld [vmem:[%s737_s12 + $0x88] sm:$0xff] }
  0x14   : > { %382 = vst.msk [vmem:[%s742_s15 + $0x28] sm:$0xff] %vm376_vm0, %v125_v5  ;;  %v138_v18 = vld [vmem:[%s737_s12 + $0x90] sm:$0xff]  ;;  %v139_v19 = vld [vmem:[%s737_s12 + $0x98] sm:$0xff]  ;;  %v140_v20 = vld [vmem:[%s737_s12 + $0xa0] sm:$0xff] }
  0x15   : > { %383 = vst.msk [vmem:[%s742_s15 + $0x30] sm:$0xff] %vm376_vm0, %v126_v6  ;;  %v141_v21 = vld [vmem:[%s737_s12 + $0xa8] sm:$0xff]  ;;  %v142_v22 = vld [vmem:[%s737_s12 + $0xb0] sm:$0xff]  ;;  %v143_v23 = vld [vmem:[%s737_s12 + $0xb8] sm:$0xff] }
  0x16   : > { %384 = vst.msk [vmem:[%s742_s15 + $0x38] sm:$0xff] %vm376_vm0, %v127_v7  ;;  %v144_v24 = vld [vmem:[%s737_s12 + $0xc0] sm:$0xff]  ;;  %v145_v25 = vld [vmem:[%s737_s12 + $0xc8] sm:$0xff]  ;;  %v146_v26 = vld [vmem:[%s737_s12 + $0xd0] sm:$0xff] }
  0x17   : > { %385 = vst.msk [vmem:[%s742_s15 + $0x40] sm:$0xff] %vm376_vm0, %v128_v8  ;;  %v147_v27 = vld [vmem:[%s737_s12 + $0xd8] sm:$0xff]  ;;  %v148_v28 = vld [vmem:[%s737_s12 + $0xe0] sm:$0xff]  ;;  %v149_v29 = vld [vmem:[%s737_s12 + $0xe8] sm:$0xff] }
  0x18   : > { %386 = vst.msk [vmem:[%s742_s15 + $0x48] sm:$0xff] %vm376_vm0, %v129_v9  ;;  %v150_v30 = vld [vmem:[%s737_s12 + $0xf0] sm:$0xff]  ;;  %v151_v31 = vld [vmem:[%s737_s12 + $0xf8] sm:$0xff]  ;;  %v152_v32 = vld [vmem:[%s737_s12 + $0x100] sm:$0xff] }
  0x19   : > { %387 = vst.msk [vmem:[%s742_s15 + $0x50] sm:$0xff] %vm376_vm0, %v130_v10  ;;  %v153_v33 = vld [vmem:[%s737_s12 + $0x108] sm:$0xff]  ;;  %v154_v34 = vld [vmem:[%s737_s12 + $0x110] sm:$0xff]  ;;  %v155_v35 = vld [vmem:[%s737_s12 + $0x118] sm:$0xff] }
  0x1a   : > { %388 = vst.msk [vmem:[%s742_s15 + $0x58] sm:$0xff] %vm376_vm0, %v131_v11  ;;  %v156_v36 = vld [vmem:[%s737_s12 + $0x120] sm:$0xff]  ;;  %v157_v37 = vld [vmem:[%s737_s12 + $0x128] sm:$0xff]  ;;  %v158_v38 = vld [vmem:[%s737_s12 + $0x130] sm:$0xff] }
  0x1b   : > { %389 = vst.msk [vmem:[%s742_s15 + $0x60] sm:$0xff] %vm376_vm0, %v132_v12  ;;  %v159_v39 = vld [vmem:[%s737_s12 + $0x138] sm:$0xff]  ;;  %v160_v40 = vld [vmem:[%s737_s12 + $0x140] sm:$0xff]  ;;  %v161_v41 = vld [vmem:[%s737_s12 + $0x148] sm:$0xff] }
  0x1c   : > { %390 = vst.msk [vmem:[%s742_s15 + $0x68] sm:$0xff] %vm376_vm0, %v133_v13  ;;  %v162_v42 = vld [vmem:[%s737_s12 + $0x150] sm:$0xff]  ;;  %v163_v43 = vld [vmem:[%s737_s12 + $0x158] sm:$0xff]  ;;  %v164_v44 = vld [vmem:[%s737_s12 + $0x160] sm:$0xff] }
  0x1d   : > { %391 = vst.msk [vmem:[%s742_s15 + $0x70] sm:$0xff] %vm376_vm0, %v134_v14  ;;  %v165_v45 = vld [vmem:[%s737_s12 + $0x168] sm:$0xff]  ;;  %v166_v46 = vld [vmem:[%s737_s12 + $0x170] sm:$0xff]  ;;  %v167_v47 = vld [vmem:[%s737_s12 + $0x178] sm:$0xff] }
  0x1e   : > { %392 = vst.msk [vmem:[%s742_s15 + $0x78] sm:$0xff] %vm376_vm0, %v135_v15  ;;  %v168_v48 = vld [vmem:[%s737_s12 + $0x180] sm:$0xff]  ;;  %v169_v49 = vld [vmem:[%s737_s12 + $0x188] sm:$0xff]  ;;  %v170_v50 = vld [vmem:[%s737_s12 + $0x190] sm:$0xff] }
  0x1f   : > { %393 = vst.msk [vmem:[%s742_s15 + $0x80] sm:$0xff] %vm376_vm0, %v136_v16  ;;  %v171_v51 = vld [vmem:[%s737_s12 + $0x198] sm:$0xff]  ;;  %v172_v52 = vld [vmem:[%s737_s12 + $0x1a0] sm:$0xff]  ;;  %v173_v53 = vld [vmem:[%s737_s12 + $0x1a8] sm:$0xff] }
  0x20   : > { %394 = vst.msk [vmem:[%s742_s15 + $0x88] sm:$0xff] %vm376_vm0, %v137_v17  ;;  %v174_v54 = vld [vmem:[%s737_s12 + $0x1b0] sm:$0xff]  ;;  %v175_v55 = vld [vmem:[%s737_s12 + $0x1b8] sm:$0xff]  ;;  %v176_v56 = vld [vmem:[%s737_s12 + $0x1c0] sm:$0xff] }
  0x21   : > { %395 = vst.msk [vmem:[%s742_s15 + $0x90] sm:$0xff] %vm376_vm0, %v138_v18  ;;  %v177_v57 = vld [vmem:[%s737_s12 + $0x1c8] sm:$0xff]  ;;  %v178_v58 = vld [vmem:[%s737_s12 + $0x1d0] sm:$0xff]  ;;  %v179_v59 = vld [vmem:[%s737_s12 + $0x1d8] sm:$0xff] }
  0x22   : > { %396 = vst.msk [vmem:[%s742_s15 + $0x98] sm:$0xff] %vm376_vm0, %v139_v19  ;;  %v180_v60 = vld [vmem:[%s737_s12 + $0x1e0] sm:$0xff]  ;;  %v181_v61 = vld [vmem:[%s737_s12 + $0x1e8] sm:$0xff]  ;;  %v182_v62 = vld [vmem:[%s737_s12 + $0x1f0] sm:$0xff] }
  0x23   : > { %397 = vst.msk [vmem:[%s742_s15 + $0xa0] sm:$0xff] %vm376_vm0, %v140_v20  ;;  %v183_v63 = vld [vmem:[%s737_s12 + $0x1f8] sm:$0xff]  ;;  %v184_v0 = vld [vmem:[%s737_s12 + $0x200] sm:$0xff]  ;;  %v185_v1 = vld [vmem:[%s737_s12 + $0x208] sm:$0xff] }
  0x24   : > { %398 = vst.msk [vmem:[%s742_s15 + $0xa8] sm:$0xff] %vm376_vm0, %v141_v21  ;;  %v186_v2 = vld [vmem:[%s737_s12 + $0x210] sm:$0xff]  ;;  %v187_v3 = vld [vmem:[%s737_s12 + $0x218] sm:$0xff]  ;;  %v188_v4 = vld [vmem:[%s737_s12 + $0x220] sm:$0xff] }
  0x25   : > { %399 = vst.msk [vmem:[%s742_s15 + $0xb0] sm:$0xff] %vm376_vm0, %v142_v22  ;;  %v189_v5 = vld [vmem:[%s737_s12 + $0x228] sm:$0xff]  ;;  %v190_v6 = vld [vmem:[%s737_s12 + $0x230] sm:$0xff]  ;;  %v191_v7 = vld [vmem:[%s737_s12 + $0x238] sm:$0xff] }
  0x26   : > { %400 = vst.msk [vmem:[%s742_s15 + $0xb8] sm:$0xff] %vm376_vm0, %v143_v23  ;;  %v192_v8 = vld [vmem:[%s737_s12 + $0x240] sm:$0xff]  ;;  %v193_v9 = vld [vmem:[%s737_s12 + $0x248] sm:$0xff]  ;;  %v194_v10 = vld [vmem:[%s737_s12 + $0x250] sm:$0xff] }
  0x27   : > { %401 = vst.msk [vmem:[%s742_s15 + $0xc0] sm:$0xff] %vm376_vm0, %v144_v24  ;;  %v195_v11 = vld [vmem:[%s737_s12 + $0x258] sm:$0xff]  ;;  %v196_v12 = vld [vmem:[%s737_s12 + $0x260] sm:$0xff]  ;;  %v197_v13 = vld [vmem:[%s737_s12 + $0x268] sm:$0xff] }
  0x28   : > { %402 = vst.msk [vmem:[%s742_s15 + $0xc8] sm:$0xff] %vm376_vm0, %v145_v25  ;;  %v198_v14 = vld [vmem:[%s737_s12 + $0x270] sm:$0xff]  ;;  %v199_v15 = vld [vmem:[%s737_s12 + $0x278] sm:$0xff]  ;;  %v200_v16 = vld [vmem:[%s737_s12 + $0x280] sm:$0xff] }
  0x29   : > { %403 = vst.msk [vmem:[%s742_s15 + $0xd0] sm:$0xff] %vm376_vm0, %v146_v26  ;;  %v201_v17 = vld [vmem:[%s737_s12 + $0x288] sm:$0xff]  ;;  %v202_v18 = vld [vmem:[%s737_s12 + $0x290] sm:$0xff]  ;;  %v203_v19 = vld [vmem:[%s737_s12 + $0x298] sm:$0xff] }
  0x2a   : > { %404 = vst.msk [vmem:[%s742_s15 + $0xd8] sm:$0xff] %vm376_vm0, %v147_v27  ;;  %v204_v20 = vld [vmem:[%s737_s12 + $0x2a0] sm:$0xff]  ;;  %v205_v21 = vld [vmem:[%s737_s12 + $0x2a8] sm:$0xff]  ;;  %v206_v22 = vld [vmem:[%s737_s12 + $0x2b0] sm:$0xff] }
  0x2b   : > { %405 = vst.msk [vmem:[%s742_s15 + $0xe0] sm:$0xff] %vm376_vm0, %v148_v28  ;;  %v207_v23 = vld [vmem:[%s737_s12 + $0x2b8] sm:$0xff]  ;;  %v208_v24 = vld [vmem:[%s737_s12 + $0x2c0] sm:$0xff]  ;;  %v209_v25 = vld [vmem:[%s737_s12 + $0x2c8] sm:$0xff] }
  0x2c   : > { %406 = vst.msk [vmem:[%s742_s15 + $0xe8] sm:$0xff] %vm376_vm0, %v149_v29  ;;  %v210_v26 = vld [vmem:[%s737_s12 + $0x2d0] sm:$0xff]  ;;  %v211_v27 = vld [vmem:[%s737_s12 + $0x2d8] sm:$0xff]  ;;  %v212_v28 = vld [vmem:[%s737_s12 + $0x2e0] sm:$0xff] }
  0x2d   : > { %407 = vst.msk [vmem:[%s742_s15 + $0xf0] sm:$0xff] %vm376_vm0, %v150_v30  ;;  %v213_v29 = vld [vmem:[%s737_s12 + $0x2e8] sm:$0xff]  ;;  %v214_v30 = vld [vmem:[%s737_s12 + $0x2f0] sm:$0xff] }
  0x2e   : > { %408 = vst.msk [vmem:[%s742_s15 + $0xf8] sm:$0xff] %vm376_vm0, %v151_v31  ;;  %v215_v31 = vld [vmem:[%s737_s12 + $0x2f8] sm:$0xff] }
  0x2f   : > { %409 = vst.msk [vmem:[%s742_s15 + $0x100] sm:$0xff] %vm376_vm0, %v152_v32  ;;  %v216_v32 = vld [vmem:[%s737_s12 + $0x300] sm:$0xff] }
  0x30   : > { %410 = vst.msk [vmem:[%s742_s15 + $0x108] sm:$0xff] %vm376_vm0, %v153_v33  ;;  %v217_v33 = vld [vmem:[%s737_s12 + $0x308] sm:$0xff] }
  0x31   : > { %411 = vst.msk [vmem:[%s742_s15 + $0x110] sm:$0xff] %vm376_vm0, %v154_v34  ;;  %v218_v34 = vld [vmem:[%s737_s12 + $0x310] sm:$0xff] }
  0x32   : > { %412 = vst.msk [vmem:[%s742_s15 + $0x118] sm:$0xff] %vm376_vm0, %v155_v35  ;;  %v219_v35 = vld [vmem:[%s737_s12 + $0x318] sm:$0xff] }
  0x33   : > { %413 = vst.msk [vmem:[%s742_s15 + $0x120] sm:$0xff] %vm376_vm0, %v156_v36  ;;  %v220_v36 = vld [vmem:[%s737_s12 + $0x320] sm:$0xff] }
  0x34   : > { %414 = vst.msk [vmem:[%s742_s15 + $0x128] sm:$0xff] %vm376_vm0, %v157_v37  ;;  %v221_v37 = vld [vmem:[%s737_s12 + $0x328] sm:$0xff] }
  0x35   : > { %415 = vst.msk [vmem:[%s742_s15 + $0x130] sm:$0xff] %vm376_vm0, %v158_v38  ;;  %v222_v38 = vld [vmem:[%s737_s12 + $0x330] sm:$0xff] }
  0x36   : > { %416 = vst.msk [vmem:[%s742_s15 + $0x138] sm:$0xff] %vm376_vm0, %v159_v39  ;;  %v223_v39 = vld [vmem:[%s737_s12 + $0x338] sm:$0xff] }
  0x37   : > { %417 = vst.msk [vmem:[%s742_s15 + $0x140] sm:$0xff] %vm376_vm0, %v160_v40  ;;  %v224_v40 = vld [vmem:[%s737_s12 + $0x340] sm:$0xff] }
  0x38   : > { %418 = vst.msk [vmem:[%s742_s15 + $0x148] sm:$0xff] %vm376_vm0, %v161_v41  ;;  %v225_v41 = vld [vmem:[%s737_s12 + $0x348] sm:$0xff] }
  0x39   : > { %419 = vst.msk [vmem:[%s742_s15 + $0x150] sm:$0xff] %vm376_vm0, %v162_v42  ;;  %v226_v42 = vld [vmem:[%s737_s12 + $0x350] sm:$0xff] }
  0x3a   : > { %420 = vst.msk [vmem:[%s742_s15 + $0x158] sm:$0xff] %vm376_vm0, %v163_v43  ;;  %v227_v43 = vld [vmem:[%s737_s12 + $0x358] sm:$0xff] }
  0x3b   : > { %421 = vst.msk [vmem:[%s742_s15 + $0x160] sm:$0xff] %vm376_vm0, %v164_v44  ;;  %v228_v44 = vld [vmem:[%s737_s12 + $0x360] sm:$0xff] }
  0x3c   : > { %422 = vst.msk [vmem:[%s742_s15 + $0x168] sm:$0xff] %vm376_vm0, %v165_v45  ;;  %v229_v45 = vld [vmem:[%s737_s12 + $0x368] sm:$0xff] }
  0x3d   : > { %423 = vst.msk [vmem:[%s742_s15 + $0x170] sm:$0xff] %vm376_vm0, %v166_v46  ;;  %v230_v46 = vld [vmem:[%s737_s12 + $0x370] sm:$0xff] }
  0x3e   : > { %424 = vst.msk [vmem:[%s742_s15 + $0x178] sm:$0xff] %vm376_vm0, %v167_v47  ;;  %v231_v47 = vld [vmem:[%s737_s12 + $0x378] sm:$0xff] }
  0x3f   : > { %425 = vst.msk [vmem:[%s742_s15 + $0x180] sm:$0xff] %vm376_vm0, %v168_v48  ;;  %v232_v48 = vld [vmem:[%s737_s12 + $0x380] sm:$0xff] }
  0x40   : > { %426 = vst.msk [vmem:[%s742_s15 + $0x188] sm:$0xff] %vm376_vm0, %v169_v49  ;;  %v233_v49 = vld [vmem:[%s737_s12 + $0x388] sm:$0xff] }
  0x41   : > { %427 = vst.msk [vmem:[%s742_s15 + $0x190] sm:$0xff] %vm376_vm0, %v170_v50  ;;  %v234_v50 = vld [vmem:[%s737_s12 + $0x390] sm:$0xff] }
  0x42   : > { %428 = vst.msk [vmem:[%s742_s15 + $0x198] sm:$0xff] %vm376_vm0, %v171_v51  ;;  %v235_v51 = vld [vmem:[%s737_s12 + $0x398] sm:$0xff] }
  0x43   : > { %429 = vst.msk [vmem:[%s742_s15 + $0x1a0] sm:$0xff] %vm376_vm0, %v172_v52  ;;  %v236_v52 = vld [vmem:[%s737_s12 + $0x3a0] sm:$0xff] }
  0x44   : > { %430 = vst.msk [vmem:[%s742_s15 + $0x1a8] sm:$0xff] %vm376_vm0, %v173_v53  ;;  %v237_v53 = vld [vmem:[%s737_s12 + $0x3a8] sm:$0xff] }
  0x45   : > { %431 = vst.msk [vmem:[%s742_s15 + $0x1b0] sm:$0xff] %vm376_vm0, %v174_v54  ;;  %v238_v54 = vld [vmem:[%s737_s12 + $0x3b0] sm:$0xff] }
  0x46   : > { %432 = vst.msk [vmem:[%s742_s15 + $0x1b8] sm:$0xff] %vm376_vm0, %v175_v55  ;;  %v239_v55 = vld [vmem:[%s737_s12 + $0x3b8] sm:$0xff] }
  0x47   : > { %433 = vst.msk [vmem:[%s742_s15 + $0x1c0] sm:$0xff] %vm376_vm0, %v176_v56  ;;  %v240_v56 = vld [vmem:[%s737_s12 + $0x3c0] sm:$0xff] }
  0x48   : > { %434 = vst.msk [vmem:[%s742_s15 + $0x1c8] sm:$0xff] %vm376_vm0, %v177_v57  ;;  %v241_v57 = vld [vmem:[%s737_s12 + $0x3c8] sm:$0xff] }
  0x49   : > { %435 = vst.msk [vmem:[%s742_s15 + $0x1d0] sm:$0xff] %vm376_vm0, %v178_v58  ;;  %v242_v58 = vld [vmem:[%s737_s12 + $0x3d0] sm:$0xff] }
  0x4a   : > { %436 = vst.msk [vmem:[%s742_s15 + $0x1d8] sm:$0xff] %vm376_vm0, %v179_v59  ;;  %v243_v59 = vld [vmem:[%s737_s12 + $0x3d8] sm:$0xff] }
  0x4b   : > { %437 = vst.msk [vmem:[%s742_s15 + $0x1e0] sm:$0xff] %vm376_vm0, %v180_v60  ;;  %v244_v60 = vld [vmem:[%s737_s12 + $0x3e0] sm:$0xff] }
  0x4c   : > { %438 = vst.msk [vmem:[%s742_s15 + $0x1e8] sm:$0xff] %vm376_vm0, %v181_v61  ;;  %v245_v61 = vld [vmem:[%s737_s12 + $0x3e8] sm:$0xff] }
  0x4d   : > { %439 = vst.msk [vmem:[%s742_s15 + $0x1f0] sm:$0xff] %vm376_vm0, %v182_v62  ;;  %v246_v62 = vld [vmem:[%s737_s12 + $0x3f0] sm:$0xff] }
  0x4e   : > { %440 = vst.msk [vmem:[%s742_s15 + $0x1f8] sm:$0xff] %vm376_vm0, %v183_v63  ;;  %v247_v63 = vld [vmem:[%s737_s12 + $0x3f8] sm:$0xff] }
  0x4f   : > { %441 = vst.msk [vmem:[%s742_s15 + $0x200] sm:$0xff] %vm376_vm0, %v184_v0  ;;  %v248_v0 = vld [vmem:[%s737_s12 + $0x400] sm:$0xff] }
  0x50   : > { %442 = vst.msk [vmem:[%s742_s15 + $0x208] sm:$0xff] %vm376_vm0, %v185_v1  ;;  %v249_v1 = vld [vmem:[%s737_s12 + $0x408] sm:$0xff] }
  0x51   : > { %443 = vst.msk [vmem:[%s742_s15 + $0x210] sm:$0xff] %vm376_vm0, %v186_v2  ;;  %v250_v2 = vld [vmem:[%s737_s12 + $0x410] sm:$0xff] }
  0x52   : > { %444 = vst.msk [vmem:[%s742_s15 + $0x218] sm:$0xff] %vm376_vm0, %v187_v3  ;;  %v251_v3 = vld [vmem:[%s737_s12 + $0x418] sm:$0xff] }
  0x53   : > { %445 = vst.msk [vmem:[%s742_s15 + $0x220] sm:$0xff] %vm376_vm0, %v188_v4  ;;  %v252_v4 = vld [vmem:[%s737_s12 + $0x420] sm:$0xff] }
  0x54   : > { %446 = vst.msk [vmem:[%s742_s15 + $0x228] sm:$0xff] %vm376_vm0, %v189_v5  ;;  %v253_v5 = vld [vmem:[%s737_s12 + $0x428] sm:$0xff] }
  0x55   : > { %447 = vst.msk [vmem:[%s742_s15 + $0x230] sm:$0xff] %vm376_vm0, %v190_v6  ;;  %v254_v6 = vld [vmem:[%s737_s12 + $0x430] sm:$0xff] }
  0x56   : > { %448 = vst.msk [vmem:[%s742_s15 + $0x238] sm:$0xff] %vm376_vm0, %v191_v7  ;;  %v255_v7 = vld [vmem:[%s737_s12 + $0x438] sm:$0xff] }
  0x57   : > { %449 = vst.msk [vmem:[%s742_s15 + $0x240] sm:$0xff] %vm376_vm0, %v192_v8  ;;  %v256_v8 = vld [vmem:[%s737_s12 + $0x440] sm:$0xff] }
  0x58   : > { %450 = vst.msk [vmem:[%s742_s15 + $0x248] sm:$0xff] %vm376_vm0, %v193_v9  ;;  %v257_v9 = vld [vmem:[%s737_s12 + $0x448] sm:$0xff] }
  0x59   : > { %451 = vst.msk [vmem:[%s742_s15 + $0x250] sm:$0xff] %vm376_vm0, %v194_v10  ;;  %v258_v10 = vld [vmem:[%s737_s12 + $0x450] sm:$0xff] }
  0x5a   : > { %452 = vst.msk [vmem:[%s742_s15 + $0x258] sm:$0xff] %vm376_vm0, %v195_v11  ;;  %v259_v11 = vld [vmem:[%s737_s12 + $0x458] sm:$0xff] }
  0x5b   : > { %453 = vst.msk [vmem:[%s742_s15 + $0x260] sm:$0xff] %vm376_vm0, %v196_v12  ;;  %v260_v12 = vld [vmem:[%s737_s12 + $0x460] sm:$0xff] }
  0x5c   : > { %454 = vst.msk [vmem:[%s742_s15 + $0x268] sm:$0xff] %vm376_vm0, %v197_v13  ;;  %v261_v13 = vld [vmem:[%s737_s12 + $0x468] sm:$0xff] }
  0x5d   : > { %455 = vst.msk [vmem:[%s742_s15 + $0x270] sm:$0xff] %vm376_vm0, %v198_v14  ;;  %v262_v14 = vld [vmem:[%s737_s12 + $0x470] sm:$0xff] }
  0x5e   : > { %456 = vst.msk [vmem:[%s742_s15 + $0x278] sm:$0xff] %vm376_vm0, %v199_v15  ;;  %v263_v15 = vld [vmem:[%s737_s12 + $0x478] sm:$0xff] }
  0x5f   : > { %457 = vst.msk [vmem:[%s742_s15 + $0x280] sm:$0xff] %vm376_vm0, %v200_v16  ;;  %v264_v16 = vld [vmem:[%s737_s12 + $0x480] sm:$0xff] }
  0x60   : > { %458 = vst.msk [vmem:[%s742_s15 + $0x288] sm:$0xff] %vm376_vm0, %v201_v17  ;;  %v265_v17 = vld [vmem:[%s737_s12 + $0x488] sm:$0xff] }
  0x61   : > { %459 = vst.msk [vmem:[%s742_s15 + $0x290] sm:$0xff] %vm376_vm0, %v202_v18  ;;  %v266_v18 = vld [vmem:[%s737_s12 + $0x490] sm:$0xff] }
  0x62   : > { %460 = vst.msk [vmem:[%s742_s15 + $0x298] sm:$0xff] %vm376_vm0, %v203_v19  ;;  %v267_v19 = vld [vmem:[%s737_s12 + $0x498] sm:$0xff] }
  0x63   : > { %461 = vst.msk [vmem:[%s742_s15 + $0x2a0] sm:$0xff] %vm376_vm0, %v204_v20  ;;  %v268_v20 = vld [vmem:[%s737_s12 + $0x4a0] sm:$0xff] }
  0x64   : > { %462 = vst.msk [vmem:[%s742_s15 + $0x2a8] sm:$0xff] %vm376_vm0, %v205_v21  ;;  %v269_v21 = vld [vmem:[%s737_s12 + $0x4a8] sm:$0xff] }
  0x65   : > { %463 = vst.msk [vmem:[%s742_s15 + $0x2b0] sm:$0xff] %vm376_vm0, %v206_v22  ;;  %v270_v22 = vld [vmem:[%s737_s12 + $0x4b0] sm:$0xff] }
  0x66   : > { %464 = vst.msk [vmem:[%s742_s15 + $0x2b8] sm:$0xff] %vm376_vm0, %v207_v23  ;;  %v271_v23 = vld [vmem:[%s737_s12 + $0x4b8] sm:$0xff] }
  0x67   : > { %465 = vst.msk [vmem:[%s742_s15 + $0x2c0] sm:$0xff] %vm376_vm0, %v208_v24  ;;  %v272_v24 = vld [vmem:[%s737_s12 + $0x4c0] sm:$0xff] }
  0x68   : > { %466 = vst.msk [vmem:[%s742_s15 + $0x2c8] sm:$0xff] %vm376_vm0, %v209_v25  ;;  %v273_v25 = vld [vmem:[%s737_s12 + $0x4c8] sm:$0xff] }
  0x69   : > { %467 = vst.msk [vmem:[%s742_s15 + $0x2d0] sm:$0xff] %vm376_vm0, %v210_v26  ;;  %v274_v26 = vld [vmem:[%s737_s12 + $0x4d0] sm:$0xff] }
  0x6a   : > { %468 = vst.msk [vmem:[%s742_s15 + $0x2d8] sm:$0xff] %vm376_vm0, %v211_v27  ;;  %v275_v27 = vld [vmem:[%s737_s12 + $0x4d8] sm:$0xff] }
  0x6b   : > { %469 = vst.msk [vmem:[%s742_s15 + $0x2e0] sm:$0xff] %vm376_vm0, %v212_v28  ;;  %v276_v28 = vld [vmem:[%s737_s12 + $0x4e0] sm:$0xff] }
  0x6c   : > { %470 = vst.msk [vmem:[%s742_s15 + $0x2e8] sm:$0xff] %vm376_vm0, %v213_v29  ;;  %v277_v29 = vld [vmem:[%s737_s12 + $0x4e8] sm:$0xff] }
  0x6d   : > { %471 = vst.msk [vmem:[%s742_s15 + $0x2f0] sm:$0xff] %vm376_vm0, %v214_v30  ;;  %v278_v30 = vld [vmem:[%s737_s12 + $0x4f0] sm:$0xff] }
  0x6e   : > { %472 = vst.msk [vmem:[%s742_s15 + $0x2f8] sm:$0xff] %vm376_vm0, %v215_v31  ;;  %v279_v31 = vld [vmem:[%s737_s12 + $0x4f8] sm:$0xff] }
  0x6f   : > { %473 = vst.msk [vmem:[%s742_s15 + $0x300] sm:$0xff] %vm376_vm0, %v216_v32  ;;  %v280_v32 = vld [vmem:[%s737_s12 + $0x500] sm:$0xff] }
  0x70   : > { %474 = vst.msk [vmem:[%s742_s15 + $0x308] sm:$0xff] %vm376_vm0, %v217_v33  ;;  %v281_v33 = vld [vmem:[%s737_s12 + $0x508] sm:$0xff] }
  0x71   : > { %475 = vst.msk [vmem:[%s742_s15 + $0x310] sm:$0xff] %vm376_vm0, %v218_v34  ;;  %v282_v34 = vld [vmem:[%s737_s12 + $0x510] sm:$0xff] }
  0x72   : > { %476 = vst.msk [vmem:[%s742_s15 + $0x318] sm:$0xff] %vm376_vm0, %v219_v35  ;;  %v283_v35 = vld [vmem:[%s737_s12 + $0x518] sm:$0xff] }
  0x73   : > { %477 = vst.msk [vmem:[%s742_s15 + $0x320] sm:$0xff] %vm376_vm0, %v220_v36  ;;  %v284_v36 = vld [vmem:[%s737_s12 + $0x520] sm:$0xff] }
  0x74   : > { %478 = vst.msk [vmem:[%s742_s15 + $0x328] sm:$0xff] %vm376_vm0, %v221_v37  ;;  %v285_v37 = vld [vmem:[%s737_s12 + $0x528] sm:$0xff] }
  0x75   : > { %479 = vst.msk [vmem:[%s742_s15 + $0x330] sm:$0xff] %vm376_vm0, %v222_v38  ;;  %v286_v38 = vld [vmem:[%s737_s12 + $0x530] sm:$0xff] }
  0x76   : > { %480 = vst.msk [vmem:[%s742_s15 + $0x338] sm:$0xff] %vm376_vm0, %v223_v39  ;;  %v287_v39 = vld [vmem:[%s737_s12 + $0x538] sm:$0xff] }
  0x77   : > { %481 = vst.msk [vmem:[%s742_s15 + $0x340] sm:$0xff] %vm376_vm0, %v224_v40  ;;  %v288_v40 = vld [vmem:[%s737_s12 + $0x540] sm:$0xff] }
  0x78   : > { %482 = vst.msk [vmem:[%s742_s15 + $0x348] sm:$0xff] %vm376_vm0, %v225_v41  ;;  %v289_v41 = vld [vmem:[%s737_s12 + $0x548] sm:$0xff] }
  0x79   : > { %483 = vst.msk [vmem:[%s742_s15 + $0x350] sm:$0xff] %vm376_vm0, %v226_v42  ;;  %v290_v42 = vld [vmem:[%s737_s12 + $0x550] sm:$0xff] }
  0x7a   : > { %484 = vst.msk [vmem:[%s742_s15 + $0x358] sm:$0xff] %vm376_vm0, %v227_v43  ;;  %v291_v43 = vld [vmem:[%s737_s12 + $0x558] sm:$0xff] }
  0x7b   : > { %485 = vst.msk [vmem:[%s742_s15 + $0x360] sm:$0xff] %vm376_vm0, %v228_v44  ;;  %v292_v44 = vld [vmem:[%s737_s12 + $0x560] sm:$0xff] }
  0x7c   : > { %486 = vst.msk [vmem:[%s742_s15 + $0x368] sm:$0xff] %vm376_vm0, %v229_v45  ;;  %v293_v45 = vld [vmem:[%s737_s12 + $0x568] sm:$0xff] }
  0x7d   : > { %487 = vst.msk [vmem:[%s742_s15 + $0x370] sm:$0xff] %vm376_vm0, %v230_v46  ;;  %v294_v46 = vld [vmem:[%s737_s12 + $0x570] sm:$0xff] }
  0x7e   : > { %488 = vst.msk [vmem:[%s742_s15 + $0x378] sm:$0xff] %vm376_vm0, %v231_v47  ;;  %v295_v47 = vld [vmem:[%s737_s12 + $0x578] sm:$0xff] }
  0x7f   : > { %489 = vst.msk [vmem:[%s742_s15 + $0x380] sm:$0xff] %vm376_vm0, %v232_v48  ;;  %v296_v48 = vld [vmem:[%s737_s12 + $0x580] sm:$0xff] }
  0x80   : > { %490 = vst.msk [vmem:[%s742_s15 + $0x388] sm:$0xff] %vm376_vm0, %v233_v49  ;;  %v297_v49 = vld [vmem:[%s737_s12 + $0x588] sm:$0xff] }
  0x81   : > { %491 = vst.msk [vmem:[%s742_s15 + $0x390] sm:$0xff] %vm376_vm0, %v234_v50  ;;  %v298_v50 = vld [vmem:[%s737_s12 + $0x590] sm:$0xff] }
  0x82   : > { %492 = vst.msk [vmem:[%s742_s15 + $0x398] sm:$0xff] %vm376_vm0, %v235_v51  ;;  %v299_v51 = vld [vmem:[%s737_s12 + $0x598] sm:$0xff] }
  0x83   : > { %493 = vst.msk [vmem:[%s742_s15 + $0x3a0] sm:$0xff] %vm376_vm0, %v236_v52  ;;  %v300_v52 = vld [vmem:[%s737_s12 + $0x5a0] sm:$0xff] }
  0x84   : > { %494 = vst.msk [vmem:[%s742_s15 + $0x3a8] sm:$0xff] %vm376_vm0, %v237_v53  ;;  %v301_v53 = vld [vmem:[%s737_s12 + $0x5a8] sm:$0xff] }
  0x85   : > { %495 = vst.msk [vmem:[%s742_s15 + $0x3b0] sm:$0xff] %vm376_vm0, %v238_v54  ;;  %v302_v54 = vld [vmem:[%s737_s12 + $0x5b0] sm:$0xff] }
  0x86   : > { %496 = vst.msk [vmem:[%s742_s15 + $0x3b8] sm:$0xff] %vm376_vm0, %v239_v55  ;;  %v303_v55 = vld [vmem:[%s737_s12 + $0x5b8] sm:$0xff] }
  0x87   : > { %497 = vst.msk [vmem:[%s742_s15 + $0x3c0] sm:$0xff] %vm376_vm0, %v240_v56  ;;  %v304_v56 = vld [vmem:[%s737_s12 + $0x5c0] sm:$0xff] }
  0x88   : > { %498 = vst.msk [vmem:[%s742_s15 + $0x3c8] sm:$0xff] %vm376_vm0, %v241_v57  ;;  %v305_v57 = vld [vmem:[%s737_s12 + $0x5c8] sm:$0xff] }
  0x89   : > { %499 = vst.msk [vmem:[%s742_s15 + $0x3d0] sm:$0xff] %vm376_vm0, %v242_v58  ;;  %v306_v58 = vld [vmem:[%s737_s12 + $0x5d0] sm:$0xff] }
  0x8a   : > { %500 = vst.msk [vmem:[%s742_s15 + $0x3d8] sm:$0xff] %vm376_vm0, %v243_v59  ;;  %v307_v59 = vld [vmem:[%s737_s12 + $0x5d8] sm:$0xff] }
  0x8b   : > { %501 = vst.msk [vmem:[%s742_s15 + $0x3e0] sm:$0xff] %vm376_vm0, %v244_v60  ;;  %v308_v60 = vld [vmem:[%s737_s12 + $0x5e0] sm:$0xff] }
  0x8c   : > { %502 = vst.msk [vmem:[%s742_s15 + $0x3e8] sm:$0xff] %vm376_vm0, %v245_v61  ;;  %v309_v61 = vld [vmem:[%s737_s12 + $0x5e8] sm:$0xff] }
  0x8d   : > { %503 = vst.msk [vmem:[%s742_s15 + $0x3f0] sm:$0xff] %vm376_vm0, %v246_v62  ;;  %v310_v62 = vld [vmem:[%s737_s12 + $0x5f0] sm:$0xff] }
  0x8e   : > { %504 = vst.msk [vmem:[%s742_s15 + $0x3f8] sm:$0xff] %vm376_vm0, %v247_v63  ;;  %v311_v63 = vld [vmem:[%s737_s12 + $0x5f8] sm:$0xff] }
  0x8f   : > { %505 = vst.msk [vmem:[%s742_s15 + $0x400] sm:$0xff] %vm376_vm0, %v248_v0  ;;  %v312_v0 = vld [vmem:[%s737_s12 + $0x600] sm:$0xff] }
  0x90   : > { %506 = vst.msk [vmem:[%s742_s15 + $0x408] sm:$0xff] %vm376_vm0, %v249_v1  ;;  %v313_v1 = vld [vmem:[%s737_s12 + $0x608] sm:$0xff] }
  0x91   : > { %507 = vst.msk [vmem:[%s742_s15 + $0x410] sm:$0xff] %vm376_vm0, %v250_v2  ;;  %v314_v2 = vld [vmem:[%s737_s12 + $0x610] sm:$0xff] }
  0x92   : > { %508 = vst.msk [vmem:[%s742_s15 + $0x418] sm:$0xff] %vm376_vm0, %v251_v3  ;;  %v315_v3 = vld [vmem:[%s737_s12 + $0x618] sm:$0xff] }
  0x93   : > { %509 = vst.msk [vmem:[%s742_s15 + $0x420] sm:$0xff] %vm376_vm0, %v252_v4  ;;  %v316_v4 = vld [vmem:[%s737_s12 + $0x620] sm:$0xff] }
  0x94   : > { %510 = vst.msk [vmem:[%s742_s15 + $0x428] sm:$0xff] %vm376_vm0, %v253_v5  ;;  %v317_v5 = vld [vmem:[%s737_s12 + $0x628] sm:$0xff] }
  0x95   : > { %511 = vst.msk [vmem:[%s742_s15 + $0x430] sm:$0xff] %vm376_vm0, %v254_v6  ;;  %v318_v6 = vld [vmem:[%s737_s12 + $0x630] sm:$0xff] }
  0x96   : > { %512 = vst.msk [vmem:[%s742_s15 + $0x438] sm:$0xff] %vm376_vm0, %v255_v7  ;;  %v319_v7 = vld [vmem:[%s737_s12 + $0x638] sm:$0xff] }
  0x97   : > { %513 = vst.msk [vmem:[%s742_s15 + $0x440] sm:$0xff] %vm376_vm0, %v256_v8  ;;  %v320_v8 = vld [vmem:[%s737_s12 + $0x640] sm:$0xff] }
  0x98   : > { %514 = vst.msk [vmem:[%s742_s15 + $0x448] sm:$0xff] %vm376_vm0, %v257_v9  ;;  %v321_v9 = vld [vmem:[%s737_s12 + $0x648] sm:$0xff] }
  0x99   : > { %515 = vst.msk [vmem:[%s742_s15 + $0x450] sm:$0xff] %vm376_vm0, %v258_v10  ;;  %v322_v10 = vld [vmem:[%s737_s12 + $0x650] sm:$0xff] }
  0x9a   : > { %516 = vst.msk [vmem:[%s742_s15 + $0x458] sm:$0xff] %vm376_vm0, %v259_v11  ;;  %v323_v11 = vld [vmem:[%s737_s12 + $0x658] sm:$0xff] }
  0x9b   : > { %517 = vst.msk [vmem:[%s742_s15 + $0x460] sm:$0xff] %vm376_vm0, %v260_v12  ;;  %v324_v12 = vld [vmem:[%s737_s12 + $0x660] sm:$0xff] }
  0x9c   : > { %518 = vst.msk [vmem:[%s742_s15 + $0x468] sm:$0xff] %vm376_vm0, %v261_v13  ;;  %v325_v13 = vld [vmem:[%s737_s12 + $0x668] sm:$0xff] }
  0x9d   : > { %519 = vst.msk [vmem:[%s742_s15 + $0x470] sm:$0xff] %vm376_vm0, %v262_v14  ;;  %v326_v14 = vld [vmem:[%s737_s12 + $0x670] sm:$0xff] }
  0x9e   : > { %520 = vst.msk [vmem:[%s742_s15 + $0x478] sm:$0xff] %vm376_vm0, %v263_v15  ;;  %v327_v15 = vld [vmem:[%s737_s12 + $0x678] sm:$0xff] }
  0x9f   : > { %521 = vst.msk [vmem:[%s742_s15 + $0x480] sm:$0xff] %vm376_vm0, %v264_v16  ;;  %v328_v16 = vld [vmem:[%s737_s12 + $0x680] sm:$0xff] }
  0xa0   : > { %522 = vst.msk [vmem:[%s742_s15 + $0x488] sm:$0xff] %vm376_vm0, %v265_v17  ;;  %v329_v17 = vld [vmem:[%s737_s12 + $0x688] sm:$0xff] }
  0xa1   : > { %523 = vst.msk [vmem:[%s742_s15 + $0x490] sm:$0xff] %vm376_vm0, %v266_v18  ;;  %v330_v18 = vld [vmem:[%s737_s12 + $0x690] sm:$0xff] }
  0xa2   : > { %524 = vst.msk [vmem:[%s742_s15 + $0x498] sm:$0xff] %vm376_vm0, %v267_v19  ;;  %v331_v19 = vld [vmem:[%s737_s12 + $0x698] sm:$0xff] }
  0xa3   : > { %525 = vst.msk [vmem:[%s742_s15 + $0x4a0] sm:$0xff] %vm376_vm0, %v268_v20  ;;  %v332_v20 = vld [vmem:[%s737_s12 + $0x6a0] sm:$0xff] }
  0xa4   : > { %526 = vst.msk [vmem:[%s742_s15 + $0x4a8] sm:$0xff] %vm376_vm0, %v269_v21  ;;  %v333_v21 = vld [vmem:[%s737_s12 + $0x6a8] sm:$0xff] }
  0xa5   : > { %527 = vst.msk [vmem:[%s742_s15 + $0x4b0] sm:$0xff] %vm376_vm0, %v270_v22  ;;  %v334_v22 = vld [vmem:[%s737_s12 + $0x6b0] sm:$0xff] }
  0xa6   : > { %528 = vst.msk [vmem:[%s742_s15 + $0x4b8] sm:$0xff] %vm376_vm0, %v271_v23  ;;  %v335_v23 = vld [vmem:[%s737_s12 + $0x6b8] sm:$0xff] }
  0xa7   : > { %529 = vst.msk [vmem:[%s742_s15 + $0x4c0] sm:$0xff] %vm376_vm0, %v272_v24  ;;  %v336_v24 = vld [vmem:[%s737_s12 + $0x6c0] sm:$0xff] }
  0xa8   : > { %530 = vst.msk [vmem:[%s742_s15 + $0x4c8] sm:$0xff] %vm376_vm0, %v273_v25  ;;  %v337_v25 = vld [vmem:[%s737_s12 + $0x6c8] sm:$0xff] }
  0xa9   : > { %531 = vst.msk [vmem:[%s742_s15 + $0x4d0] sm:$0xff] %vm376_vm0, %v274_v26  ;;  %v338_v26 = vld [vmem:[%s737_s12 + $0x6d0] sm:$0xff] }
  0xaa   : > { %532 = vst.msk [vmem:[%s742_s15 + $0x4d8] sm:$0xff] %vm376_vm0, %v275_v27  ;;  %v339_v27 = vld [vmem:[%s737_s12 + $0x6d8] sm:$0xff] }
  0xab   : > { %533 = vst.msk [vmem:[%s742_s15 + $0x4e0] sm:$0xff] %vm376_vm0, %v276_v28  ;;  %v340_v28 = vld [vmem:[%s737_s12 + $0x6e0] sm:$0xff] }
  0xac   : > { %534 = vst.msk [vmem:[%s742_s15 + $0x4e8] sm:$0xff] %vm376_vm0, %v277_v29  ;;  %v341_v29 = vld [vmem:[%s737_s12 + $0x6e8] sm:$0xff] }
  0xad   : > { %535 = vst.msk [vmem:[%s742_s15 + $0x4f0] sm:$0xff] %vm376_vm0, %v278_v30  ;;  %v342_v30 = vld [vmem:[%s737_s12 + $0x6f0] sm:$0xff] }
  0xae   : > { %536 = vst.msk [vmem:[%s742_s15 + $0x4f8] sm:$0xff] %vm376_vm0, %v279_v31  ;;  %v343_v31 = vld [vmem:[%s737_s12 + $0x6f8] sm:$0xff] }
  0xaf   : > { %537 = vst.msk [vmem:[%s742_s15 + $0x500] sm:$0xff] %vm376_vm0, %v280_v32  ;;  %v344_v32 = vld [vmem:[%s737_s12 + $0x700] sm:$0xff] }
  0xb0   : > { %538 = vst.msk [vmem:[%s742_s15 + $0x508] sm:$0xff] %vm376_vm0, %v281_v33  ;;  %v345_v33 = vld [vmem:[%s737_s12 + $0x708] sm:$0xff] }
  0xb1   : > { %539 = vst.msk [vmem:[%s742_s15 + $0x510] sm:$0xff] %vm376_vm0, %v282_v34  ;;  %v346_v34 = vld [vmem:[%s737_s12 + $0x710] sm:$0xff] }
  0xb2   : > { %540 = vst.msk [vmem:[%s742_s15 + $0x518] sm:$0xff] %vm376_vm0, %v283_v35  ;;  %v347_v35 = vld [vmem:[%s737_s12 + $0x718] sm:$0xff] }
  0xb3   : > { %541 = vst.msk [vmem:[%s742_s15 + $0x520] sm:$0xff] %vm376_vm0, %v284_v36  ;;  %v348_v36 = vld [vmem:[%s737_s12 + $0x720] sm:$0xff] }
  0xb4   : > { %542 = vst.msk [vmem:[%s742_s15 + $0x528] sm:$0xff] %vm376_vm0, %v285_v37  ;;  %v349_v37 = vld [vmem:[%s737_s12 + $0x728] sm:$0xff] }
  0xb5   : > { %543 = vst.msk [vmem:[%s742_s15 + $0x530] sm:$0xff] %vm376_vm0, %v286_v38  ;;  %v350_v38 = vld [vmem:[%s737_s12 + $0x730] sm:$0xff] }
  0xb6   : > { %544 = vst.msk [vmem:[%s742_s15 + $0x538] sm:$0xff] %vm376_vm0, %v287_v39  ;;  %v351_v39 = vld [vmem:[%s737_s12 + $0x738] sm:$0xff] }
  0xb7   : > { %545 = vst.msk [vmem:[%s742_s15 + $0x540] sm:$0xff] %vm376_vm0, %v288_v40  ;;  %v352_v40 = vld [vmem:[%s737_s12 + $0x740] sm:$0xff] }
  0xb8   : > { %546 = vst.msk [vmem:[%s742_s15 + $0x548] sm:$0xff] %vm376_vm0, %v289_v41  ;;  %v353_v41 = vld [vmem:[%s737_s12 + $0x748] sm:$0xff] }
  0xb9   : > { %547 = vst.msk [vmem:[%s742_s15 + $0x550] sm:$0xff] %vm376_vm0, %v290_v42  ;;  %v354_v42 = vld [vmem:[%s737_s12 + $0x750] sm:$0xff] }
  0xba   : > { %548 = vst.msk [vmem:[%s742_s15 + $0x558] sm:$0xff] %vm376_vm0, %v291_v43  ;;  %v355_v43 = vld [vmem:[%s737_s12 + $0x758] sm:$0xff] }
  0xbb   : > { %549 = vst.msk [vmem:[%s742_s15 + $0x560] sm:$0xff] %vm376_vm0, %v292_v44  ;;  %v356_v44 = vld [vmem:[%s737_s12 + $0x760] sm:$0xff] }
  0xbc   : > { %550 = vst.msk [vmem:[%s742_s15 + $0x568] sm:$0xff] %vm376_vm0, %v293_v45  ;;  %v357_v45 = vld [vmem:[%s737_s12 + $0x768] sm:$0xff] }
  0xbd   : > { %551 = vst.msk [vmem:[%s742_s15 + $0x570] sm:$0xff] %vm376_vm0, %v294_v46  ;;  %v358_v46 = vld [vmem:[%s737_s12 + $0x770] sm:$0xff] }
  0xbe   : > { %552 = vst.msk [vmem:[%s742_s15 + $0x578] sm:$0xff] %vm376_vm0, %v295_v47  ;;  %v359_v47 = vld [vmem:[%s737_s12 + $0x778] sm:$0xff] }
  0xbf   : > { %553 = vst.msk [vmem:[%s742_s15 + $0x580] sm:$0xff] %vm376_vm0, %v296_v48  ;;  %v360_v48 = vld [vmem:[%s737_s12 + $0x780] sm:$0xff] }
  0xc0   : > { %554 = vst.msk [vmem:[%s742_s15 + $0x588] sm:$0xff] %vm376_vm0, %v297_v49  ;;  %v361_v49 = vld [vmem:[%s737_s12 + $0x788] sm:$0xff] }
  0xc1   : > { %555 = vst.msk [vmem:[%s742_s15 + $0x590] sm:$0xff] %vm376_vm0, %v298_v50  ;;  %v362_v50 = vld [vmem:[%s737_s12 + $0x790] sm:$0xff] }
  0xc2   : > { %556 = vst.msk [vmem:[%s742_s15 + $0x598] sm:$0xff] %vm376_vm0, %v299_v51  ;;  %v363_v51 = vld [vmem:[%s737_s12 + $0x798] sm:$0xff] }
  0xc3   : > { %557 = vst.msk [vmem:[%s742_s15 + $0x5a0] sm:$0xff] %vm376_vm0, %v300_v52  ;;  %v364_v52 = vld [vmem:[%s737_s12 + $0x7a0] sm:$0xff] }
  0xc4   : > { %558 = vst.msk [vmem:[%s742_s15 + $0x5a8] sm:$0xff] %vm376_vm0, %v301_v53  ;;  %v365_v53 = vld [vmem:[%s737_s12 + $0x7a8] sm:$0xff] }
  0xc5   : > { %559 = vst.msk [vmem:[%s742_s15 + $0x5b0] sm:$0xff] %vm376_vm0, %v302_v54  ;;  %v366_v54 = vld [vmem:[%s737_s12 + $0x7b0] sm:$0xff] }
  0xc6   : > { %560 = vst.msk [vmem:[%s742_s15 + $0x5b8] sm:$0xff] %vm376_vm0, %v303_v55  ;;  %v367_v55 = vld [vmem:[%s737_s12 + $0x7b8] sm:$0xff] }
  0xc7   : > { %561 = vst.msk [vmem:[%s742_s15 + $0x5c0] sm:$0xff] %vm376_vm0, %v304_v56  ;;  %v368_v56 = vld [vmem:[%s737_s12 + $0x7c0] sm:$0xff] }
  0xc8   : > { %562 = vst.msk [vmem:[%s742_s15 + $0x5c8] sm:$0xff] %vm376_vm0, %v305_v57  ;;  %v369_v57 = vld [vmem:[%s737_s12 + $0x7c8] sm:$0xff] }
  0xc9   : > { %563 = vst.msk [vmem:[%s742_s15 + $0x5d0] sm:$0xff] %vm376_vm0, %v306_v58  ;;  %v370_v58 = vld [vmem:[%s737_s12 + $0x7d0] sm:$0xff] }
  0xca   : > { %564 = vst.msk [vmem:[%s742_s15 + $0x5d8] sm:$0xff] %vm376_vm0, %v307_v59  ;;  %v371_v59 = vld [vmem:[%s737_s12 + $0x7d8] sm:$0xff] }
  0xcb   : > { %565 = vst.msk [vmem:[%s742_s15 + $0x5e0] sm:$0xff] %vm376_vm0, %v308_v60  ;;  %v372_v60 = vld [vmem:[%s737_s12 + $0x7e0] sm:$0xff] }
  0xcc   : > { %566 = vst.msk [vmem:[%s742_s15 + $0x5e8] sm:$0xff] %vm376_vm0, %v309_v61  ;;  %v373_v61 = vld [vmem:[%s737_s12 + $0x7e8] sm:$0xff] }
  0xcd   : > { %567 = vst.msk [vmem:[%s742_s15 + $0x5f0] sm:$0xff] %vm376_vm0, %v310_v62  ;;  %v374_v62 = vld [vmem:[%s737_s12 + $0x7f0] sm:$0xff] }
  0xce   : > { %568 = vst.msk [vmem:[%s742_s15 + $0x5f8] sm:$0xff] %vm376_vm0, %v311_v63  ;;  %v375_v63 = vld [vmem:[%s737_s12 + $0x7f8] sm:$0xff] }
  0xcf   : > { %569 = vst.msk [vmem:[%s742_s15 + $0x600] sm:$0xff] %vm376_vm0, %v312_v0 }
  0xd0   : > { %570 = vst.msk [vmem:[%s742_s15 + $0x608] sm:$0xff] %vm376_vm0, %v313_v1 }
  0xd1   : > { %571 = vst.msk [vmem:[%s742_s15 + $0x610] sm:$0xff] %vm376_vm0, %v314_v2 }
  0xd2   : > { %572 = vst.msk [vmem:[%s742_s15 + $0x618] sm:$0xff] %vm376_vm0, %v315_v3 }
  0xd3   : > { %573 = vst.msk [vmem:[%s742_s15 + $0x620] sm:$0xff] %vm376_vm0, %v316_v4 }
  0xd4   : > { %574 = vst.msk [vmem:[%s742_s15 + $0x628] sm:$0xff] %vm376_vm0, %v317_v5 }
  0xd5   : > { %575 = vst.msk [vmem:[%s742_s15 + $0x630] sm:$0xff] %vm376_vm0, %v318_v6 }
  0xd6   : > { %576 = vst.msk [vmem:[%s742_s15 + $0x638] sm:$0xff] %vm376_vm0, %v319_v7 }
  0xd7   : > { %577 = vst.msk [vmem:[%s742_s15 + $0x640] sm:$0xff] %vm376_vm0, %v320_v8 }
  0xd8   : > { %578 = vst.msk [vmem:[%s742_s15 + $0x648] sm:$0xff] %vm376_vm0, %v321_v9 }
  0xd9   : > { %579 = vst.msk [vmem:[%s742_s15 + $0x650] sm:$0xff] %vm376_vm0, %v322_v10 }
  0xda   : > { %580 = vst.msk [vmem:[%s742_s15 + $0x658] sm:$0xff] %vm376_vm0, %v323_v11 }
  0xdb   : > { %581 = vst.msk [vmem:[%s742_s15 + $0x660] sm:$0xff] %vm376_vm0, %v324_v12 }
  0xdc   : > { %582 = vst.msk [vmem:[%s742_s15 + $0x668] sm:$0xff] %vm376_vm0, %v325_v13 }
  0xdd   : > { %583 = vst.msk [vmem:[%s742_s15 + $0x670] sm:$0xff] %vm376_vm0, %v326_v14 }
  0xde   : > { %584 = vst.msk [vmem:[%s742_s15 + $0x678] sm:$0xff] %vm376_vm0, %v327_v15 }
  0xdf   : > { %585 = vst.msk [vmem:[%s742_s15 + $0x680] sm:$0xff] %vm376_vm0, %v328_v16 }
  0xe0   : > { %586 = vst.msk [vmem:[%s742_s15 + $0x688] sm:$0xff] %vm376_vm0, %v329_v17 }
  0xe1   : > { %587 = vst.msk [vmem:[%s742_s15 + $0x690] sm:$0xff] %vm376_vm0, %v330_v18 }
  0xe2   : > { %588 = vst.msk [vmem:[%s742_s15 + $0x698] sm:$0xff] %vm376_vm0, %v331_v19 }
  0xe3   : > { %589 = vst.msk [vmem:[%s742_s15 + $0x6a0] sm:$0xff] %vm376_vm0, %v332_v20 }
  0xe4   : > { %590 = vst.msk [vmem:[%s742_s15 + $0x6a8] sm:$0xff] %vm376_vm0, %v333_v21 }
  0xe5   : > { %591 = vst.msk [vmem:[%s742_s15 + $0x6b0] sm:$0xff] %vm376_vm0, %v334_v22 }
  0xe6   : > { %592 = vst.msk [vmem:[%s742_s15 + $0x6b8] sm:$0xff] %vm376_vm0, %v335_v23 }
  0xe7   : > { %593 = vst.msk [vmem:[%s742_s15 + $0x6c0] sm:$0xff] %vm376_vm0, %v336_v24 }
  0xe8   : > { %594 = vst.msk [vmem:[%s742_s15 + $0x6c8] sm:$0xff] %vm376_vm0, %v337_v25 }
  0xe9   : > { %595 = vst.msk [vmem:[%s742_s15 + $0x6d0] sm:$0xff] %vm376_vm0, %v338_v26 }
  0xea   : > { %596 = vst.msk [vmem:[%s742_s15 + $0x6d8] sm:$0xff] %vm376_vm0, %v339_v27 }
  0xeb   : > { %597 = vst.msk [vmem:[%s742_s15 + $0x6e0] sm:$0xff] %vm376_vm0, %v340_v28 }
  0xec   : > { %598 = vst.msk [vmem:[%s742_s15 + $0x6e8] sm:$0xff] %vm376_vm0, %v341_v29 }
  0xed   : > { %599 = vst.msk [vmem:[%s742_s15 + $0x6f0] sm:$0xff] %vm376_vm0, %v342_v30 }
  0xee   : > { %600 = vst.msk [vmem:[%s742_s15 + $0x6f8] sm:$0xff] %vm376_vm0, %v343_v31 }
  0xef   : > { %601 = vst.msk [vmem:[%s742_s15 + $0x700] sm:$0xff] %vm376_vm0, %v344_v32 }
  0xf0   : > { %602 = vst.msk [vmem:[%s742_s15 + $0x708] sm:$0xff] %vm376_vm0, %v345_v33 }
  0xf1   : > { %603 = vst.msk [vmem:[%s742_s15 + $0x710] sm:$0xff] %vm376_vm0, %v346_v34 }
  0xf2   : > { %604 = vst.msk [vmem:[%s742_s15 + $0x718] sm:$0xff] %vm376_vm0, %v347_v35 }
  0xf3   : > { %605 = vst.msk [vmem:[%s742_s15 + $0x720] sm:$0xff] %vm376_vm0, %v348_v36 }
  0xf4   : > { %606 = vst.msk [vmem:[%s742_s15 + $0x728] sm:$0xff] %vm376_vm0, %v349_v37 }
  0xf5   : > { %607 = vst.msk [vmem:[%s742_s15 + $0x730] sm:$0xff] %vm376_vm0, %v350_v38 }
  0xf6   : > { %608 = vst.msk [vmem:[%s742_s15 + $0x738] sm:$0xff] %vm376_vm0, %v351_v39 }
  0xf7   : > { %609 = vst.msk [vmem:[%s742_s15 + $0x740] sm:$0xff] %vm376_vm0, %v352_v40 }
  0xf8   : > { %610 = vst.msk [vmem:[%s742_s15 + $0x748] sm:$0xff] %vm376_vm0, %v353_v41 }
  0xf9   : > { %611 = vst.msk [vmem:[%s742_s15 + $0x750] sm:$0xff] %vm376_vm0, %v354_v42 }
  0xfa   : > { %612 = vst.msk [vmem:[%s742_s15 + $0x758] sm:$0xff] %vm376_vm0, %v355_v43 }
  0xfb   : > { %613 = vst.msk [vmem:[%s742_s15 + $0x760] sm:$0xff] %vm376_vm0, %v356_v44 }
  0xfc   : > { %614 = vst.msk [vmem:[%s742_s15 + $0x768] sm:$0xff] %vm376_vm0, %v357_v45 }
  0xfd   : > { %615 = vst.msk [vmem:[%s742_s15 + $0x770] sm:$0xff] %vm376_vm0, %v358_v46 }
  0xfe   : > { %616 = vst.msk [vmem:[%s742_s15 + $0x778] sm:$0xff] %vm376_vm0, %v359_v47 }
  0xff   : > { %617 = vst.msk [vmem:[%s742_s15 + $0x780] sm:$0xff] %vm376_vm0, %v360_v48 }
 0x100   : > { %618 = vst.msk [vmem:[%s742_s15 + $0x788] sm:$0xff] %vm376_vm0, %v361_v49 }
 0x101   : > { %619 = vst.msk [vmem:[%s742_s15 + $0x790] sm:$0xff] %vm376_vm0, %v362_v50 }
 0x102   : > { %620 = vst.msk [vmem:[%s742_s15 + $0x798] sm:$0xff] %vm376_vm0, %v363_v51 }
 0x103   : > { %621 = vst.msk [vmem:[%s742_s15 + $0x7a0] sm:$0xff] %vm376_vm0, %v364_v52 }
 0x104   : > { %622 = vst.msk [vmem:[%s742_s15 + $0x7a8] sm:$0xff] %vm376_vm0, %v365_v53 }
 0x105   : > { %623 = vst.msk [vmem:[%s742_s15 + $0x7b0] sm:$0xff] %vm376_vm0, %v366_v54 }
 0x106   : > { %624 = vst.msk [vmem:[%s742_s15 + $0x7b8] sm:$0xff] %vm376_vm0, %v367_v55 }
 0x107   : > { %625 = vst.msk [vmem:[%s742_s15 + $0x7c0] sm:$0xff] %vm376_vm0, %v368_v56 }
 0x108   : > { %626 = vst.msk [vmem:[%s742_s15 + $0x7c8] sm:$0xff] %vm376_vm0, %v369_v57 }
 0x109   : > { %627 = vst.msk [vmem:[%s742_s15 + $0x7d0] sm:$0xff] %vm376_vm0, %v370_v58 }
 0x10a   : > { %628 = vst.msk [vmem:[%s742_s15 + $0x7d8] sm:$0xff] %vm376_vm0, %v371_v59 }
 0x10b   : > { %629 = vst.msk [vmem:[%s742_s15 + $0x7e0] sm:$0xff] %vm376_vm0, %v372_v60 }
 0x10c   : > { %630 = vst.msk [vmem:[%s742_s15 + $0x7e8] sm:$0xff] %vm376_vm0, %v373_v61 }
 0x10d   : > { %631 = vst.msk [vmem:[%s742_s15 + $0x7f0] sm:$0xff] %vm376_vm0, %v374_v62 }
 0x10e   : > { %632 = vst.msk [vmem:[%s742_s15 + $0x7f8] sm:$0xff] %vm376_vm0, %v375_v63 }
 0x10f PF: > { %s11_s6 = sadd.s32 1, %s714_s6  }
 0x110   : > { %p8_p4 = scmp.ge.s32.totalorder %s11_s6, 4  }
 0x112   :  { %10 = sbr.rel (!%p8_p4) target bundleno = 1 (0x1), region = 54 }

</bundles_post_ra>
